<compile_context>
chip_gen: v5e
topology: v5e:2x2
jax: 0.10.0
libtpu: 0.0.40
codegen_flags: <defaults>
</compile_context>

<pallas_src>
import math

import jax
import jax.numpy as jnp
import numpy as np
from jax.experimental import pallas as pl
from jax.experimental.pallas import tpu as pltpu


def _posenc_kernel(x_ref, rep_ref, freq_ref, phase_ref, out_ref):
    # x_ref:     (tile_g, G*C)  input coords, G samples packed per row
    # rep_ref:   (G*C, W) bf16  0/1 block-diagonal lane-replication matrix (resident)
    # freq_ref:  (1, W) f32     per-column frequency (resident)
    # phase_ref: (1, W) f32     0 in sin columns, pi/2 in cos columns (resident)
    # out_ref:   (tile_g, W)    W = G * 2*F*C (lane-dense)
    x = x_ref[...].astype(jnp.float32)

    # Exact 3-way bf16 split of x: x == hi + mid + lo at f32 accuracy, each term
    # exactly representable in bf16. Multiplying the splits by a 0/1 matrix on
    # the MXU (native 1-pass bf16 matmuls, f32 accumulate) reconstructs x
    # exactly while keeping the lane replication off the VPU/XLU slots that the
    # sin polynomial saturates.
    x_hi = x.astype(jnp.bfloat16)
    r1 = x - x_hi.astype(jnp.float32)
    x_mid = r1.astype(jnp.bfloat16)
    x_lo = (r1 - x_mid.astype(jnp.float32)).astype(jnp.bfloat16)

    rep = rep_ref[...]
    x_rep = jnp.dot(x_hi, rep, preferred_element_type=jnp.float32)
    x_rep += jnp.dot(x_mid, rep, preferred_element_type=jnp.float32)
    x_rep += jnp.dot(x_lo, rep, preferred_element_type=jnp.float32)

    # sin(x*f) in sin columns, sin(x*f + pi/2) == cos(x*f) in cos columns:
    # one lane-dense transcendental pass + one unmasked full-width store.
    out_ref[...] = jnp.sin(x_rep * freq_ref[...] + phase_ref[...]).astype(out_ref.dtype)


def positional_encoding(x, max_freq, num_freqs, *, tile_samples=8192):
    """x: (num_rays, num_samples, C) -> (num_rays, num_samples, 2*num_freqs*C)."""
    num_rays, num_samples, C = x.shape
    N = num_rays * num_samples
    F = num_freqs
    out_dim = 2 * F * C
    out_dtype = jnp.promote_types(x.dtype, jnp.float32)

    # Group size: pack G samples per kernel row so the output block is lane-dense
    # (G*out_dim a multiple of 128). Cap W for pathological huge C*F.
    G = 128 // math.gcd(out_dim, 128)
    while G > 1 and G * out_dim > 8192:
        G //= 2
    W = G * out_dim
    Kw = G * C

    # ---- trace-time constants (max_freq / num_freqs are static) ----
    freqs = 2.0 ** np.linspace(0.0, float(max_freq), F, dtype=np.float32)   # (F,)
    j = np.arange(out_dim)
    k = (j % (F * C)) // C          # frequency index of column j
    c = j % C                       # channel index of column j
    s = j // (F * C)                # 0 = sin half, 1 = cos half
    rep1 = np.zeros((C, out_dim), np.float32)
    rep1[c, j] = 1.0                                        # x[:, c] -> column j
    rep_np = np.kron(np.eye(G, dtype=np.float32), rep1)     # (Kw, W) block diagonal
    freq_np = np.tile(freqs[k], G)[None, :].astype(np.float32)              # (1, W)
    phase_np = np.tile((np.pi / 2.0) * s, G)[None, :].astype(np.float32)    # (1, W)

    rep = jnp.asarray(rep_np, dtype=jnp.bfloat16)           # 0/1 -> exact in bf16
    freq_row = jnp.asarray(freq_np)
    phase_row = jnp.asarray(phase_np)

    # ---- pack N samples into rows of G (free reshape on the common path) ----
    itemsize_in = jnp.dtype(x.dtype).itemsize
    itemsize_out = jnp.dtype(out_dtype).itemsize
    row_align = {4: 8, 2: 16, 1: 32}.get(min(itemsize_in, itemsize_out), 8)

    n_pad = pl.cdiv(N, G) * G
    if n_pad // G < 8:
        n_pad = 8 * G               # keep MXU M-dim >= 8 for tiny inputs
    x_flat = x.reshape(N, C)
    if n_pad != N:
        # TODO(synk): ragged N costs one small input pad + one output slice copy;
        # callers with N % G == 0 (typical num_samples) hit the zero-copy path.
        x_flat = jnp.pad(x_flat, ((0, n_pad - N), (0, 0)))
    T = n_pad // G
    x_grp = x_flat.reshape(T, Kw)

    # ---- tile sizing: lane-padding-aware VMEM estimate (double-buffered blocks
    # + full-width f32 temporaries), conservative 20 MiB budget. ----
    lane = 128
    kw_pad = pl.cdiv(Kw, lane) * lane
    w_pad = pl.cdiv(W, lane) * lane
    bytes_per_row = (2 * kw_pad * max(itemsize_in, 4)
                     + 2 * w_pad * itemsize_out
                     + 2 * w_pad * 4)
    const_bytes = 2 * (rep.size * 2 + (freq_row.size + phase_row.size) * 4)
    vmem_budget = (20 << 20) - const_bytes
    max_tile = max(row_align, int(vmem_budget // bytes_per_row))
    tile_g = max(row_align, min(max_tile, max(1, tile_samples // G)))
    tile_g = (tile_g // row_align) * row_align
    if tile_g >= T:
        tile_g = T                  # single block; block dims == full dims is legal
    grid = (pl.cdiv(T, tile_g),)

    out_grp = pl.pallas_call(
        _posenc_kernel,
        out_shape=jax.ShapeDtypeStruct((T, W), out_dtype),
        grid=grid,
        in_specs=[
            pl.BlockSpec((tile_g, Kw), lambda i: (i, 0)),
            pl.BlockSpec((Kw, W), lambda i: (0, 0)),   # resident across grid
            pl.BlockSpec((1, W), lambda i: (0, 0)),    # resident across grid
            pl.BlockSpec((1, W), lambda i: (0, 0)),    # resident across grid
        ],
        out_specs=pl.BlockSpec((tile_g, W), lambda i: (i, 0)),
        compiler_params=pltpu.CompilerParams(
            dimension_semantics=("parallel",),
            vmem_limit_bytes=32 * 1024 * 1024,
        ),
    )(x_grp, rep, freq_row, phase_row)

    out_flat = out_grp.reshape(n_pad, out_dim)
    if n_pad != N:
        out_flat = out_flat[:N]
    return out_flat.reshape(num_rays, num_samples, out_dim)


def _reference(x, max_freq, num_freqs):
    freqs = (2.0 ** jnp.linspace(0.0, float(max_freq), num_freqs)).astype(jnp.float32)
    x32 = x.astype(jnp.float32)
    x_proj = x32[..., None, :] * freqs[:, None]                # (..., F, C)
    x_proj = x_proj.reshape(*x.shape[:-1], -1)                 # (..., F*C)
    return jnp.concatenate([jnp.sin(x_proj), jnp.cos(x_proj)], axis=-1)


if __name__ == "__main__":
    # Case 1: module-doc shapes, moderate frequencies -> tight tolerance.
    x1 = jax.random.uniform(jax.random.PRNGKey(0), (2, 8, 3), jnp.float32,
                            minval=-1.0, maxval=1.0)
    out1 = jax.block_until_ready(positional_encoding(x1, 4, 4))
    ref1 = _reference(x1, 4, 4)
    assert out1.shape == (2, 8, 2 * 4 * 3)
    assert jnp.allclose(out1, ref1, atol=1e-5, rtol=1e-5)

    # Case 2: multi-step grid with a ragged last block (N=320, G=32 -> T=10,
    # tile of 8 grouped rows -> 2 grid steps). max_freq=10 puts phases at ~2^10
    # rad, where one f32 ulp of the phase is ~1.2e-4 -> agreement with the f32
    # reference is bounded by that, hence the looser tolerance.
    x2 = jax.random.uniform(jax.random.PRNGKey(1), (8, 40, 3), jnp.float32,
                            minval=-1.0, maxval=1.0)
    out2 = jax.block_until_ready(positional_encoding(x2, 10, 6, tile_samples=256))
    ref2 = _reference(x2, 10, 6)
    assert out2.shape == (8, 40, 2 * 6 * 3)
    assert jnp.allclose(out2, ref2, atol=1e-3, rtol=1e-5)

    # Case 3: N % G != 0 -> exercises the pad + final-slice path.
    x3 = jax.random.uniform(jax.random.PRNGKey(2), (4, 37, 3), jnp.float32,
                            minval=-1.0, maxval=1.0)
    out3 = jax.block_until_ready(positional_encoding(x3, 10, 6))
    ref3 = _reference(x3, 10, 6)
    assert out3.shape == (4, 37, 2 * 6 * 3)
    assert jnp.allclose(out3, ref3, atol=1e-3, rtol=1e-5)

    print("KERNEL_OK")
</pallas_src>

<mosaic_0001>
module attributes {stable_mosaic.version = 11 : i64} {
  func.func @_posenc_kernel(%arg0: i32, %arg1: memref<8x48xf32, #tpu.memory_space<vmem>>, %arg2: memref<48x384xbf16, #tpu.memory_space<vmem>>, %arg3: memref<1x384xf32, #tpu.memory_space<vmem>>, %arg4: memref<1x384xf32, #tpu.memory_space<vmem>>, %arg5: memref<8x384xf32, #tpu.memory_space<vmem>>) attributes {dimension_semantics = [#tpu.dimension_semantics<parallel>], iteration_bounds = array<i64: 1>, scalar_prefetch = 0 : i64, scratch_operands = 0 : i64, tpu.core_type = #tpu.core_type<tc>, window_params = [{transform_indices = @transform_0, window_bounds = array<i64: 8, 48>}, {pipeline_mode = #tpu.pipeline_mode<synchronous>, transform_indices = @transform_1, window_bounds = array<i64: 48, 384>}, {pipeline_mode = #tpu.pipeline_mode<synchronous>, transform_indices = @transform_2, window_bounds = array<i64: 1, 384>}, {pipeline_mode = #tpu.pipeline_mode<synchronous>, transform_indices = @transform_3, window_bounds = array<i64: 1, 384>}, {transform_indices = @transform_4, window_bounds = array<i64: 8, 384>}]} {
    %c0 = arith.constant 0 : index
    %c0_0 = arith.constant 0 : index
    %0 = vector.load %arg1[%c0, %c0_0] : memref<8x48xf32, #tpu.memory_space<vmem>>, vector<8x48xf32>
    %1 = arith.truncf %0 : vector<8x48xf32> to vector<8x48xbf16>
    %2 = arith.extf %1 : vector<8x48xbf16> to vector<8x48xf32>
    %3 = arith.subf %0, %2 : vector<8x48xf32>
    %4 = arith.truncf %3 : vector<8x48xf32> to vector<8x48xbf16>
    %5 = arith.extf %4 : vector<8x48xbf16> to vector<8x48xf32>
    %6 = arith.subf %3, %5 : vector<8x48xf32>
    %7 = arith.truncf %6 : vector<8x48xf32> to vector<8x48xbf16>
    %c0_1 = arith.constant 0 : index
    %c0_2 = arith.constant 0 : index
    %8 = vector.load %arg2[%c0_1, %c0_2] : memref<48x384xbf16, #tpu.memory_space<vmem>>, vector<48x384xbf16>
    %cst = arith.constant dense<0.000000e+00> : vector<8x384xf32>
    %9 = tpu.matmul %1, %8, %cst {dimension_numbers = #tpu.dot_dimension_numbers<[1], [0], [0], [1], [0, 0, 1, 1], [], []>} : vector<8x48xbf16>, vector<48x384xbf16>, vector<8x384xf32> -> vector<8x384xf32>
    %cst_3 = arith.constant dense<0.000000e+00> : vector<8x384xf32>
    %10 = tpu.matmul %4, %8, %cst_3 {dimension_numbers = #tpu.dot_dimension_numbers<[1], [0], [0], [1], [0, 0, 1, 1], [], []>} : vector<8x48xbf16>, vector<48x384xbf16>, vector<8x384xf32> -> vector<8x384xf32>
    %11 = arith.addf %9, %10 : vector<8x384xf32>
    %cst_4 = arith.constant dense<0.000000e+00> : vector<8x384xf32>
    %12 = tpu.matmul %7, %8, %cst_4 {dimension_numbers = #tpu.dot_dimension_numbers<[1], [0], [0], [1], [0, 0, 1, 1], [], []>} : vector<8x48xbf16>, vector<48x384xbf16>, vector<8x384xf32> -> vector<8x384xf32>
    %13 = arith.addf %11, %12 : vector<8x384xf32>
    %c0_5 = arith.constant 0 : index
    %c0_6 = arith.constant 0 : index
    %14 = vector.load %arg3[%c0_5, %c0_6] : memref<1x384xf32, #tpu.memory_space<vmem>>, vector<1x384xf32>
    %15 = vector.broadcast %14 : vector<1x384xf32> to vector<8x384xf32>
    %16 = arith.mulf %13, %15 : vector<8x384xf32>
    %c0_7 = arith.constant 0 : index
    %c0_8 = arith.constant 0 : index
    %17 = vector.load %arg4[%c0_7, %c0_8] : memref<1x384xf32, #tpu.memory_space<vmem>>, vector<1x384xf32>
    %18 = vector.broadcast %17 : vector<1x384xf32> to vector<8x384xf32>
    %19 = arith.addf %16, %18 : vector<8x384xf32>
    %20 = math.sin %19 : vector<8x384xf32>
    %c0_9 = arith.constant 0 : index
    %c0_10 = arith.constant 0 : index
    %21 = vector.load %arg5[%c0_9, %c0_10] : memref<8x384xf32, #tpu.memory_space<vmem>>, vector<8x384xf32>
    tpu.vector_store %arg5[%c0_9, %c0_10], %20 {strides = array<i32>} : memref<8x384xf32, #tpu.memory_space<vmem>>, vector<8x384xf32>,
    return
  }
  func.func @transform_0(%arg0: i32) -> (i32, i32) {
    %c0_i32 = arith.constant 0 : i32
    %c0_i32_0 = arith.constant 0 : i32
    return %arg0, %c0_i32 : i32, i32
  }
  func.func @transform_1(%arg0: i32) -> (i32, i32) {
    %c0_i32 = arith.constant 0 : i32
    %c0_i32_0 = arith.constant 0 : i32
    %c0_i32_1 = arith.constant 0 : i32
    return %c0_i32, %c0_i32_0 : i32, i32
  }
  func.func @transform_2(%arg0: i32) -> (i32, i32) {
    %c0_i32 = arith.constant 0 : i32
    %c0_i32_0 = arith.constant 0 : i32
    %c0_i32_1 = arith.constant 0 : i32
    return %c0_i32, %c0_i32_0 : i32, i32
  }
  func.func @transform_3(%arg0: i32) -> (i32, i32) {
    %c0_i32 = arith.constant 0 : i32
    %c0_i32_0 = arith.constant 0 : i32
    %c0_i32_1 = arith.constant 0 : i32
    return %c0_i32, %c0_i32_0 : i32, i32
  }
  func.func @transform_4(%arg0: i32) -> (i32, i32) {
    %c0_i32 = arith.constant 0 : i32
    %c0_i32_0 = arith.constant 0 : i32
    return %arg0, %c0_i32 : i32, i32
  }
}

</mosaic_0001>

<bundles_post_ra>
// kernel: tpu_custom_call.1
= control target key start
LH: loop header
LB: loop body
LE: loop exit
PB: predicated region body
PF: predicated region fallthrough
CT: control target
= control target key end

     0   :  { %9 = vsyncpa [#allocation3], 0  ;;  %s1344_s0 = inlined_call_operand.hbm [shape: f32[8,48], index: 0, kind: input, shape index: {}]   ;;  %s1345_s1 = inlined_call_operand.hbm [shape: bf16[48,384], index: 1, kind: input, shape index: {}]   ;;  %s1346_s2 = inlined_call_operand.hbm [shape: f32[1,384], index: 2, kind: input, shape index: {}]   ;;  %s1347_s3 = inlined_call_operand.hbm [shape: f32[1,384], index: 3, kind: input, shape index: {}]   ;;  %s1348_s4 = inlined_call_operand.hbm [shape: f32[8,384], index: 4, kind: output, shape index: {}]  }
   0x1   :  { %10 = vsyncpa [#allocation6], 0 }
   0x2   :  { %11 = vsyncpa [#allocation9], 0  ;;  %s28_s17 = sshll.u32 %s1345_s1, 4  ;;  %s29_s17 = int_to_ptr.hbm [resolvable:$true] %s28_s17 }
   0x3   :  { %12 = vsyncpa [#allocation4], 0  ;;  %s988_s18 = smov [#allocation5]   ;;  %s18_s22 = sshll.u32 %s1344_s0, 4  ;;  %s19_s22 = int_to_ptr.hbm [resolvable:$true] %s18_s22 }
   0x4   :  { %s30_s19 = sshll.u32 %s988_s18, 4  ;;  %s989_s23 = smov 192   ;;  %s31_s19 = int_to_ptr.vmem [resolvable:$true] %s30_s19 }
   0x5   :  { %s990_s24 = smov 12   ;;  %s991_s25 = smov [#allocation2]  }
   0x6   :  { %36 = dma.hbm_to_vmem [thread:$0]  %s29_s17, 1152, %s31_s19, [#allocation6], %s989_s23, %s989_s23, %s990_s24  }
   0x7   :  { %s20_s26 = sshll.u32 %s991_s25, 4  ;;  %s42_s29 = sshll.u32 %s1346_s2, 4  ;;  %s21_s26 = int_to_ptr.vmem [resolvable:$true] %s20_s26  ;;  %s43_s29 = int_to_ptr.hbm [resolvable:$true] %s42_s29 }
   0x8   :  { %23 = dma.hbm_to_vmem [thread:$0]  %s19_s22, 128, %s21_s26, [#allocation3]  }
   0x9   :  { %s53_s5 = sshll.u32 %s1347_s3, 4  ;;  %s992_s6 = smov [#allocation7]   ;;  %s54_s5 = int_to_ptr.hbm [resolvable:$true] %s53_s5 }
   0xa   :  { %s44_s7 = sshll.u32 %s992_s6, 4  ;;  %s993_s0 = smov [#allocation8]   ;;  %s45_s7 = int_to_ptr.vmem [resolvable:$true] %s44_s7 }
   0xb   :  { %47 = dma.hbm_to_vmem [thread:$0]  %s43_s29, 48, %s45_s7, [#allocation6]  }
   0xc   :  { %s55_s8 = sshll.u32 %s993_s0, 4  ;;  %s56_s8 = int_to_ptr.vmem [resolvable:$true] %s55_s8 }
   0xd   :  { %58 = dma.hbm_to_vmem [thread:$0]  %s54_s5, 48, %s56_s8, [#allocation9]  }
   0xe   :  { %980 = dma.done.wait [#allocation3], 128  }
   0xf   :  { %981 = vsyncadd [#allocation3], 4294967168 }
  0x10   :  { %982 = dma.done.wait [#allocation6], 1200  }
  0x11   :  { %983 = vsyncadd [#allocation6], 4294966096 }
  0x12   :  { %984 = dma.done.wait [#allocation9], 48  }
  0x13   :  { %985 = vsyncadd [#allocation9], 4294967248  ;;  %v809_v0 = vld [vmem:[#allocation5 + $0x30] sm:$0xf]  ;;  %v844_v1 = vld [vmem:[#allocation5 + $0x38] sm:$0xf0] }
  0x14   :  { %v843_v2 = vld [vmem:[#allocation5 + $0x34] sm:$0xf]  ;;  %v810_v3 = vor.u32 %v844_v1, %v809_v0  ;;  %v811_v4 = vld [vmem:[#allocation5 + $0x3c] sm:$0xf0]  ;;  %v817_v5 = vld [vmem:[#allocation5 + $0x38] sm:$0xf] }
  0x15   :  { %v845_v6 = vld [vmem:[#allocation5 + $0x40] sm:$0xf0]  ;;  %v814_v7 = vor.u32 %v843_v2, %v811_v4  ;;  %v797_v9 = vld [vmem:[#allocation5 + $0x18] sm:$0xf]  ;;  %v840_v11 = vld [vmem:[#allocation5 + $0x1c] sm:$0xf] }
  0x16   :  { %v818_v8 = vor.u32 %v845_v6, %v817_v5  ;;  %v841_v10 = vld [vmem:[#allocation5 + $0x20] sm:$0xf0]  ;;  %153 = vmatpush.bf16.msra.mxu0 %v810_v3  ;;  %195 = vmatpush.bf16.msra.mxu3 %v810_v3  ;;  %v799_v13 = vld [vmem:[#allocation5 + $0x24] sm:$0xf0]  ;;  %v805_v14 = vld [vmem:[#allocation5 + $0x20] sm:$0xf] }
  0x17   :  { %v798_v12 = vor.u32 %v841_v10, %v797_v9  ;;  %v842_v15 = vld [vmem:[#allocation5 + $0x28] sm:$0xf0]  ;;  %166 = vmatpush.bf16.msra.mxu1 %v814_v7  ;;  %v802_v16 = vor.u32 %v840_v11, %v799_v13  ;;  %v785_v18 = vld [vmem:[#allocation5] sm:$0xf]  ;;  %v837_v20 = vld [vmem:[#allocation5 + $0x4] sm:$0xf] }
  0x18   :  { %179 = vmatpush.bf16.msra.mxu2 %v818_v8  ;;  %v806_v17 = vor.u32 %v842_v15, %v805_v14  ;;  %v838_v19 = vld [vmem:[#allocation5 + $0x8] sm:$0xf0]  ;;  %v787_v21 = vld [vmem:[#allocation5 + $0xc] sm:$0xf0]  ;;  %v793_v22 = vld [vmem:[#allocation5 + $0x8] sm:$0xf] }
  0x19   :  { %v839_v23 = vld [vmem:[#allocation5 + $0x10] sm:$0xf0]  ;;  %v76_v24 = vld [vmem:[#allocation2] sm:$0xff]  ;;  %v786_v25 = vor.u32 %v838_v19, %v785_v18  ;;  %v790_v27 = vor.u32 %v837_v20, %v787_v21  ;;  %vm144_vm0 = vcmask 392192   ;;  %v274_v45 = vld [vmem:[#allocation7] sm:$0x7] }
  0x1a   :  { %154 = vmatpush.bf16.msra.mxu0 %v798_v12  ;;  %196 = vmatpush.bf16.msra.mxu3 %v798_v12  ;;  %v77_v26 = vpack.c.bf16 %v76_v24, %v76_v24  ;;  %v794_v28 = vor.u32 %v839_v23, %v793_v22  ;;  %v1048_v46 = vld [vmem:[#allocation8] sm:$0x7]  ;;  %v277_v48 = vperm.slane %v274_v45, 1  ;;  %v276_v51 = vperm.slane %v274_v45, 0  ;;  %s1001_s2 = smov [#allocation10]   ;;  %s771_s11 = sshll.u32 %s1348_s4, 4  ;;  %s772_s11 = int_to_ptr.hbm [resolvable:$true] %s771_s11 }
  0x1b   :  { %167 = vmatpush.bf16.msra.mxu1 %v802_v16  ;;  %v288_v53 = vperm.slane %v1048_v46, 1  ;;  %v287_v56 = vperm.slane %v1048_v46, 0  ;;  %s769_s3 = sshll.u32 %s1001_s2, 4  ;;  %s770_s3 = int_to_ptr.vmem [resolvable:$true] %s769_s3 }
  0x1c   :  { %180 = vmatpush.bf16.msra.mxu2 %v806_v17  ;;  %v78_v29 = vunpack.c.l.bf16 %v77_v26 }
  0x1e   :  { %155 = vmatpush.bf16.msra.mxu0 %v786_v25  ;;  %197 = vmatpush.bf16.msra.mxu3 %v786_v25  ;;  %v79_v30 = vsub.f32 %v76_v24, %v78_v29 }
  0x1f   :  { %168 = vmatpush.bf16.msra.mxu1 %v790_v27 }
  0x20   :  { %181 = vmatpush.bf16.msra.mxu2 %v794_v28  ;;  %v80_v31 = vpack.c.bf16 %v79_v30, %v79_v30 }
  0x21   :  { %822 = vmatmul.msk.bf16.vlgmr.msra.gmra.mxu3 %vm144_vm0, %v77_v26 }
  0x22   :  { %208 = vmatpush.bf16.msrb.mxu0 %v814_v7  ;;  %820 = vmatmul.msk.bf16.vlgmr.msra.gmra.mxu1 %vm144_vm0, %v80_v31  ;;  %v81_v32 = vunpack.c.l.bf16 %v80_v31 }
  0x23   :  { %221 = vmatpush.bf16.msrb.mxu1 %v818_v8  ;;  %819 = vmatmul.msk.bf16.vlgmr.msra.gmra.mxu0 %vm144_vm0, %v80_v31 }
  0x24   :  { %237 = vmatpush.bf16.msrb.mxu2 %v810_v3  ;;  %250 = vmatpush.bf16.msrb.mxu3 %v814_v7  ;;  %v82_v33 = vsub.f32 %v79_v30, %v81_v32 }
  0x25   :  { %821 = vmatmul.msk.bf16.vlgmr.msra.gmra.mxu2 %vm144_vm0, %v80_v31 }
  0x26   :  { %209 = vmatpush.bf16.msrb.mxu0 %v802_v16  ;;  %v83_v34 = vpack.c.bf16 %v82_v33, %v82_v33 }
  0x27   :  { %222 = vmatpush.bf16.msrb.mxu1 %v806_v17 }
  0x28   :  { %238 = vmatpush.bf16.msrb.mxu2 %v798_v12  ;;  %251 = vmatpush.bf16.msrb.mxu3 %v802_v16 }
  0x2a   :  { %210 = vmatpush.bf16.msrb.mxu0 %v790_v27 }
  0x2b   :  { %223 = vmatpush.bf16.msrb.mxu1 %v794_v28 }
  0x2c   :  { %239 = vmatpush.bf16.msrb.mxu2 %v786_v25  ;;  %252 = vmatpush.bf16.msrb.mxu3 %v790_v27  ;;  %v289_v25 = vperm.slane %v1048_v46, 2 }
  0x2e   :  { %263 = vmatpush.bf16.msra.mxu0 %v818_v8 }
  0x31   :  { %826 = vmatmul.msk.bf16.vlgmr.msrb.gmra.mxu3 %vm144_vm0, %v83_v34 }
  0x32   :  { %264 = vmatpush.bf16.msra.mxu0 %v806_v17  ;;  %824 = vmatmul.msk.bf16.vlgmr.msrb.gmra.mxu1 %vm144_vm0, %v77_v26  ;;  %v278_v17 = vperm.slane %v274_v45, 2 }
  0x33   :  { %823 = vmatmul.msk.bf16.vlgmr.msrb.gmra.mxu0 %vm144_vm0, %v77_v26 }
  0x35   :  { %825 = vmatmul.msk.bf16.vlgmr.msrb.gmra.mxu2 %vm144_vm0, %v83_v34 }
  0x36   :  { %265 = vmatpush.bf16.msra.mxu0 %v794_v28 }
  0x43   :  { %827 = vmatmul.msk.bf16.vlgmr.msra.gmra.mxu0 %vm144_vm0, %v83_v34  ;;  %v994_v34 = vmov 683565275  }
  0x9f   :  { %v170_v36 = vpop.f32.mrf.mxu1 }
  0xa0   :  { %v157_v35 = vpop.f32.mrf.mxu0 }
  0xa4   :  { %v199_v37 = vpop.f32.mrf.mxu3 }
  0xa5   :  { %v200_v50 = vadd.f32 %v199_v37, %v157_v35  ;;  %v995_v37 = vmov 2475754826  }
  0xa7   :  { %v172_v40 = vpop.f32.mrf.mxu1 }
  0xa8   :  { %v183_v38 = vpop.f32.mrf.mxu2  ;;  %v159_v39 = vpop.f32.mrf.mxu0 }
  0xa9   :  { %v996_v39 = vmov 2131351028  }
  0xac   :  { %v201_v41 = vpop.f32.mrf.mxu3 }
  0xaf   :  { %v225_v44 = vpop.f32.mrf.mxu1 }
  0xb0   :  { %v185_v42 = vpop.f32.mrf.mxu2  ;;  %v212_v43 = vpop.f32.mrf.mxu0  ;;  %v226_v14 = vadd.f32 %v225_v44, %v183_v38  ;;  %v997_v44 = vmov 2102212464  }
  0xb1   :  { %v213_v47 = vadd.f32 %v212_v43, %v170_v36 }
  0xb4   :  { %v254_v49 = vpop.f32.mrf.mxu3 }
  0xb5   :  { %v272_v52 = vadd.f32 %v254_v49, %v213_v47 }
  0xb7   :  { %v283_v57 = vmul.f32 %v277_v48, %v272_v52  ;;  %v227_v59 = vpop.f32.mrf.mxu1  ;;  %v998_v48 = vmov 920167782  }
  0xb8   :  { %v241_v54 = vpop.f32.mrf.mxu2  ;;  %v214_v58 = vpop.f32.mrf.mxu0 }
  0xb9   :  { %v271_v55 = vadd.f32 %v241_v54, %v200_v50  ;;  %v1052_v61 = vadd.f32 %v288_v53, %v283_v57 }
  0xbb   :  { %v282_v60 = vmul.f32 %v276_v51, %v271_v55  ;;  %v451_v63 = vand.u32 2147483647, %v1052_v61  ;;  %v454_v0 = vand.u32 2139095040, %v1052_v61  ;;  %v999_v51 = vmov 1326507024  }
  0xbc   :  { %v256_v1 = vpop.f32.mrf.mxu3 }
  0xbd   :  { %v1054_v62 = vadd.f32 %v287_v56, %v282_v60  ;;  %v455_v4 = vshrl.u32 %v454_v0, 23  ;;  %v458_v5 = vand.u32 8388607, %v451_v63 }
  0xbf   :  { %v296_v2 = vand.u32 2147483647, %v1054_v62  ;;  %v299_v3 = vand.u32 2139095040, %v1054_v62  ;;  %v831_v10 = vadd.s32 4294967169, %v455_v4  ;;  %v459_v11 = vor.u32 8388608, %v458_v5 }
  0xc0   :  { %v243_v6 = vpop.f32.mrf.mxu2  ;;  %v267_v9 = vpop.f32.mrf.mxu0 }
  0xc1   :  { %v300_v7 = vshrl.u32 %v299_v3, 23  ;;  %v303_v8 = vand.u32 8388607, %v296_v2  ;;  %v461_v15 = vadd.s32 1, %v831_v10  ;;  %v1066_v19 = vshll.u32 %v459_v11, 8 }
  0xc2   :  { %v273_v20 = vadd.f32 %v267_v9, %v226_v14 }
  0xc3   :  { %v828_v12 = vadd.s32 4294967169, %v300_v7  ;;  %v304_v13 = vor.u32 8388608, %v303_v8  ;;  %vm462_vm1 = vcmp.gt.s32.totalorder %v461_v15, 0  ;;  %v1075_v29 = vand.u32 65535, %v1066_v19 }
  0xc4   :  { %v463_v21 = vsel %vm462_vm1, %v461_v15, 0  ;;  %v1077_v30 = vmul.f32 %v278_v17, %v273_v20 }
  0xc5   :  { %v306_v16 = vadd.s32 1, %v828_v12  ;;  %v1064_v18 = vshll.u32 %v304_v13, 8  ;;  %v1068_v23 = vand.u32 31, %v463_v21 }
  0xc7   :  { %vm307_vm2 = vcmp.gt.s32.totalorder %v306_v16, 0  ;;  %v1072_v28 = vand.u32 65535, %v1064_v18  ;;  %v1080_v32 = vshrl.u32 %v1064_v18, 16  ;;  %v1083_v33 = vsub.s32 32, %v1068_v23 }
  0xc8   :  { %v308_v22 = vsel %vm307_vm2, %v306_v16, 0  ;;  %v269_v26 = vpop.f32.mrf.mxu0  ;;  %v468_v35 = vshll.u32 %v994_v34, %v1068_v23  ;;  %v471_v41 = vshll.u32 %v995_v37, %v1068_v23  ;;  %v474_v12 = vshll.u32 %v996_v39, %v1068_v23 }
  0xc9   :  { %v310_v24 = vand.u32 31, %v308_v22  ;;  %v309_v27 = vshrl.u32 %v308_v22, 5  ;;  %v469_v4 = vshrl.u32 %v995_v37, %v1083_v33  ;;  %v472_v5 = vshrl.u32 %v996_v39, %v1083_v33 }
  0xca   :  { %v475_v13 = vshrl.u32 %v997_v44, %v1083_v33  ;;  %v1116_v22 = vshrl.u32 %v463_v21, 5  ;;  %v478_v21 = vshrl.u32 %v998_v48, %v1083_v33 }
  0xcb   :  { %v311_v31 = vsub.s32 32, %v310_v24  ;;  %v313_v36 = vshll.u32 %v994_v34, %v310_v24  ;;  %v316_v38 = vshll.u32 %v995_v37, %v310_v24  ;;  %v319_v40 = vshll.u32 %v996_v39, %v310_v24 }
  0xcc   :  { %v322_v47 = vshll.u32 %v997_v44, %v310_v24  ;;  %v325_v50 = vshll.u32 %v998_v48, %v310_v24  ;;  %vm328_vm3 = vcmp.lt.s32.totalorder %v309_v27, 1  ;;  %vm329_vm4 = vcmp.lt.s32.totalorder %v309_v27, 2 }
  0xcd   :  { %v314_v42 = vshrl.u32 %v995_v37, %v311_v31  ;;  %v317_v43 = vshrl.u32 %v996_v39, %v311_v31  ;;  %v320_v45 = vshrl.u32 %v997_v44, %v311_v31  ;;  %v323_v49 = vshrl.u32 %v998_v48, %v311_v31 }
  0xce   :  { %v326_v52 = vshrl.u32 %v999_v51, %v311_v31  ;;  %v312_v56 = vshrl.u32 %v994_v34, %v311_v31  ;;  %vm331_vm5 = vcmp.lt.s32.totalorder %v309_v27, 4  ;;  %vm330_vm6 = vcmp.lt.s32.totalorder %v309_v27, 3 }
  0xcf   :  { %v315_v53 = vor.u32 %v314_v42, %v313_v36  ;;  %v318_v54 = vor.u32 %v317_v43, %v316_v38  ;;  %v321_v55 = vor.u32 %v320_v45, %v319_v40  ;;  %v324_v57 = vor.u32 %v323_v49, %v322_v47 }
  0xd0   :  { %v327_v58 = vor.u32 %v326_v52, %v325_v50  ;;  %v1118_v24 = vor.u32 %v469_v4, %v468_v35  ;;  %v1120_v26 = vor.u32 %v472_v5, %v471_v41  ;;  %v1124_v38 = vor.u32 %v475_v13, %v474_v12 }
  0xd1   :  { %v333_v59 = vsel %vm331_vm5, %v321_v55, 2102212464  ;;  %v336_v60 = vsel %vm328_vm3, %v315_v53, %v318_v54  ;;  %v340_v0 = vsel %vm328_vm3, %v318_v54, %v321_v55  ;;  %v337_v1 = vsel %vm331_vm5, %v324_v57, 920167782 }
  0xd2   :  { %v341_v3 = vsel %vm331_vm5, %v327_v58, 1326507024  ;;  %v332_v6 = vsel %vm328_vm3, %v312_v56, %v315_v53  ;;  %v334_v7 = vsel %vm330_vm6, %v318_v54, %v333_v59  ;;  %v338_v8 = vsel %vm330_vm6, %v321_v55, %v337_v1 }
  0xd3   :  { %v342_v9 = vsel %vm330_vm6, %v324_v57, %v341_v3  ;;  %v339_v10 = vsel %vm329_vm4, %v336_v60, %v338_v8  ;;  %v1114_v20 = vsel %vm329_vm4, %v332_v6, %v334_v7  ;;  %v477_v40 = vshll.u32 %v997_v44, %v1068_v23 }
  0xd4   :  { %v343_v11 = vsel %vm329_vm4, %v340_v0, %v342_v9  ;;  %v369_v16 = vand.u32 65535, %v339_v10  ;;  %v370_v17 = vshrl.u32 %v339_v10, 16  ;;  %v480_v35 = vshll.u32 %v998_v48, %v1068_v23 }
  0xd5   :  { %v347_v14 = vand.u32 65535, %v343_v11  ;;  %v348_v15 = vshrl.u32 %v343_v11, 16  ;;  %v481_v56 = vshrl.u32 %v999_v51, %v1083_v33  ;;  %v1000_v57 = vmov 0  }
  0xd6   :  { %v372_v42 = vmul.u32 %v370_v17, %v1072_v28  ;;  %v373_v27 = vmul.u32 %v369_v16, %v1080_v32  ;;  %v371_v47 = vmul.u32 %v369_v16, %v1072_v28  ;;  %v374_v52 = vmul.u32 %v370_v17, %v1080_v32 }
  0xd7   :  { %v350_v31 = vmul.u32 %v348_v15, %v1072_v28  ;;  %v351_v36 = vmul.u32 %v347_v14, %v1080_v32  ;;  %v349_v41 = vmul.u32 %v347_v14, %v1072_v28  ;;  %v352_v43 = vmul.u32 %v348_v15, %v1080_v32 }
  0xd8   :  { %v375_v53 = vshll.u32 %v372_v42, 16  ;;  %v377_v58 = vshll.u32 %v373_v27, 16  ;;  %v479_v0 = vor.u32 %v478_v21, %v477_v40  ;;  %v482_v3 = vor.u32 %v481_v56, %v480_v35 }
  0xd9   :  { %v353_v45 = vshll.u32 %v350_v31, 16  ;;  %v354_v49 = vshrl.u32 %v350_v31, 16  ;;  %v355_v50 = vshll.u32 %v351_v36, 16  ;;  %v356_v54 = vshrl.u32 %v351_v36, 16 }
  0xda   :  { %vm379_vm8 = vc.u32 %v371_v47, %v375_v53  ;;  %v381_v59 = vadd.s32 %v375_v53, %v371_v47  ;;  %v376_v5 = vshrl.u32 %v372_v42, 16  ;;  %vm483_vm11 = vcmp.lt.s32.totalorder %v1116_v22, 1 }
  0xdb   :  { %vm357_vm7 = vc.u32 %v349_v41, %v353_v45  ;;  %v359_v55 = vadd.s32 %v353_v45, %v349_v41  ;;  %v380_v28 = vsel %vm379_vm8, 1, %v1000_v57  ;;  %v378_v7 = vshrl.u32 %v373_v27, 16 }
  0xdc   :  { %v358_v23 = vsel %vm357_vm7, 1, %v1000_v57  ;;  %v382_v1 = vadd.s32 %v380_v28, %v374_v52  ;;  %vm383_vm10 = vc.u32 %v381_v59, %v377_v58  ;;  %vm486_vm12 = vcmp.lt.s32.totalorder %v1116_v22, 4 }
  0xdd   :  { %v360_v60 = vadd.s32 %v358_v23, %v352_v43  ;;  %vm361_vm9 = vc.u32 %v359_v55, %v355_v50  ;;  %v384_v6 = vsel %vm383_vm10, 1, %v1000_v57  ;;  %v491_v9 = vsel %vm483_vm11, %v1118_v24, %v1120_v26 }
  0xde   :  { %v362_v32 = vsel %vm361_vm9, 1, %v1000_v57  ;;  %v386_v8 = vadd.s32 %v384_v6, %v382_v1  ;;  %vm485_vm13 = vcmp.lt.s32.totalorder %v1116_v22, 3  ;;  %v492_v11 = vsel %vm486_vm12, %v479_v0, 920167782 }
  0xdf   :  { %v364_v4 = vadd.s32 %v362_v32, %v360_v60  ;;  %v495_v12 = vsel %vm483_vm11, %v1120_v26, %v1124_v38  ;;  %vm484_vm14 = vcmp.lt.s32.totalorder %v1116_v22, 2  ;;  %v493_v14 = vsel %vm485_vm13, %v1124_v38, %v492_v11 }
  0xe0   :  { %v387_v13 = vadd.s32 %v386_v8, %v376_v5  ;;  %v496_v15 = vsel %vm486_vm12, %v482_v3, 1326507024  ;;  %v1165_v17 = vadd.s32 %v381_v59, %v377_v58  ;;  %v494_v31 = vsel %vm484_vm14, %v491_v9, %v493_v14 }
  0xe1   :  { %v365_v10 = vadd.s32 %v364_v4, %v354_v49  ;;  %v497_v36 = vsel %vm485_vm13, %v479_v0, %v496_v15  ;;  %v524_v27 = vand.u32 65535, %v494_v31  ;;  %v525_v21 = vshrl.u32 %v494_v31, 16 }
  0xe2   :  { %v388_v40 = vadd.s32 %v387_v13, %v378_v7  ;;  %v498_v42 = vsel %vm484_vm14, %v495_v12, %v497_v36  ;;  %v501_v35 = vshrl.u32 %v1066_v19, 16  ;;  %v389_v49 = vmul.u32 %v1064_v18, %v1114_v20 }
  0xe3   :  { %v1163_v16 = vadd.s32 %v365_v10, %v356_v54  ;;  %v502_v41 = vand.u32 65535, %v498_v42  ;;  %v503_v43 = vshrl.u32 %v498_v42, 16  ;;  %v527_v47 = vmul.u32 %v525_v21, %v1075_v29 }
  0xe4   :  { %v392_v45 = vadd.s32 1, %v388_v40  ;;  %v526_v54 = vmul.u32 %v524_v27, %v1075_v29  ;;  %v528_v55 = vmul.u32 %v524_v27, %v501_v35  ;;  %v1185_v60 = vadd.f32 %v289_v25, %v1077_v30 }
  0xe5   :  { %vm391_vm15 = vc.u32 %v1163_v16, %v1165_v17  ;;  %v505_v50 = vmul.u32 %v503_v43, %v1075_v29  ;;  %v506_v52 = vmul.u32 %v502_v41, %v501_v35  ;;  %v530_v56 = vshll.u32 %v527_v47, 16 }
  0xe6   :  { %v393_v53 = vsel %vm391_vm15, %v392_v45, %v388_v40  ;;  %v504_v58 = vmul.u32 %v502_v41, %v1075_v29  ;;  %v507_v28 = vmul.u32 %v503_v43, %v501_v35  ;;  %v529_v18 = vmul.u32 %v525_v21, %v501_v35 }
  0xe7   :  { %v394_v23 = vadd.s32 %v393_v53, %v389_v49  ;;  %v508_v59 = vshll.u32 %v505_v50, 16  ;;  %v510_v0 = vshll.u32 %v506_v52, 16  ;;  %vm534_vm0 = vc.u32 %v526_v54, %v530_v56 }
  0xe8   :  { %v535_v1 = vsel %vm534_vm0, 1, %v1000_v57  ;;  %v532_v4 = vshll.u32 %v528_v55, 16  ;;  %v536_v5 = vadd.s32 %v530_v56, %v526_v54  ;;  %v488_v46 = vsel %vm486_vm12, %v1124_v38, 2102212464 }
  0xe9   :  { %v395_v20 = vadd.s32 536870912, %v394_v23  ;;  %vm512_vm1 = vc.u32 %v504_v58, %v508_v59  ;;  %v514_v32 = vadd.s32 %v508_v59, %v504_v58  ;;  %v537_v29 = vadd.s32 %v535_v1, %v529_v18 }
  0xea   :  { %v513_v3 = vsel %vm512_vm1, 1, %v1000_v57  ;;  %v467_v30 = vshrl.u32 %v994_v34, %v1083_v33  ;;  %v509_v7 = vshrl.u32 %v505_v50, 16  ;;  %vm538_vm3 = vc.u32 %v536_v5, %v532_v4 }
  0xeb   :  { %v1189_v6 = vshrl.u32 %v395_v20, 30  ;;  %v515_v25 = vadd.s32 %v513_v3, %v507_v28  ;;  %vm516_vm2 = vc.u32 %v514_v32, %v510_v0  ;;  %v539_v11 = vsel %vm538_vm3, 1, %v1000_v57 }
  0xec   :  { %v517_v8 = vsel %vm516_vm2, 1, %v1000_v57  ;;  %v609_v12 = vand.u32 2139095040, %v1185_v60  ;;  %v487_v38 = vsel %vm483_vm11, %v467_v30, %v1118_v24  ;;  %v489_v13 = vsel %vm485_vm13, %v1120_v26, %v488_v46 }
  0xed   :  { %v397_v9 = vshll.u32 %v1189_v6, 30  ;;  %v519_v10 = vadd.s32 %v517_v8, %v515_v25  ;;  %v531_v33 = vshrl.u32 %v527_v47, 16  ;;  %v541_v14 = vadd.s32 %v539_v11, %v537_v29 }
  0xee   :  { %v511_v31 = vshrl.u32 %v506_v52, 16  ;;  %v610_v40 = vshrl.u32 %v609_v12, 23  ;;  %v533_v42 = vshrl.u32 %v528_v55, 16  ;;  %v1206_v27 = vadd.s32 %v536_v5, %v532_v4 }
  0xef   :  { %v398_v15 = vsub.s32 %v394_v23, %v397_v9  ;;  %v520_v36 = vadd.s32 %v519_v10, %v509_v7  ;;  %v542_v21 = vadd.s32 %v541_v14, %v531_v33  ;;  %v490_v24 = vsel %vm484_vm14, %v487_v38, %v489_v13 }
  0xf0   :  { %v834_v43 = vadd.s32 4294967169, %v610_v40  ;;  %v606_v26 = vand.u32 2147483647, %v1185_v60  ;;  %v544_v53 = vmul.u32 %v1066_v19, %v490_v24  ;;  %v390_v59 = vadd.s32 %v1165_v17, %v1163_v16 }
  0xf1   :  { %vm399_vm4 = vcmp.lt.s32.totalorder %v398_v15, 0  ;;  %v400_v35 = vsub.s32 0, %v398_v15  ;;  %v1208_v41 = vadd.s32 %v520_v36, %v511_v31  ;;  %v543_v45 = vadd.s32 %v542_v21, %v533_v42 }
  0xf2   :  { %v616_v49 = vadd.s32 1, %v834_v43  ;;  %v613_v56 = vand.u32 8388607, %v606_v26  ;;  %vm298_vm13 = vcmp.lt.s32.totalorder %v1054_v62, 0  ;;  %vm1267_vm15 = vcmp.le.f32.partialorder %v296_v2, 0.7853982 }
  0xf3   :  { %v401_v47 = vsel %vm399_vm4, %v400_v35, %v398_v15  ;;  %vm546_vm5 = vc.u32 %v1208_v41, %v1206_v27  ;;  %v547_v52 = vadd.s32 1, %v543_v45  ;;  %vm453_vm4 = vcmp.lt.s32.totalorder %v1052_v61, 0 }
  0xf4   :  { %v402_v50 = vclz %v401_v47  ;;  %vm617_vm6 = vcmp.gt.s32.totalorder %v616_v49, 0  ;;  %v614_v1 = vor.u32 8388608, %v613_v56 }
  0xf5   :  { %v548_v55 = vsel %vm546_vm5, %v547_v52, %v543_v45  ;;  %v618_v22 = vsel %vm617_vm6, %v616_v49, 0  ;;  %vm1297_vm5 = vcmp.le.f32.partialorder %v451_v63, 0.7853982 }
  0xf6   :  { %v829_v54 = vadd.s32 4294967294, %v402_v50  ;;  %v549_v23 = vadd.s32 %v548_v55, %v544_v53  ;;  %v620_v58 = vand.u32 31, %v618_v22  ;;  %v1220_v19 = vshrl.u32 %v618_v22, 5 }
  0xf7   :  { %v1242_v21 = vshll.u32 %v614_v1, 8  ;;  %v545_v1 = vadd.s32 %v1206_v27, %v1208_v41 }
  0xf8   :  { %vm830_vm7 = vcmp.lt.s32.totalorder %v829_v54, 0  ;;  %v550_v0 = vadd.s32 536870912, %v549_v23  ;;  %v621_v18 = vsub.s32 32, %v620_v58  ;;  %v623_v4 = vshll.u32 %v994_v34, %v620_v58 }
  0xf9   :  { %v405_v28 = vsel %vm830_vm7, 0, %v829_v54  ;;  %v626_v16 = vshll.u32 %v995_v37, %v620_v58  ;;  %v629_v9 = vshll.u32 %v996_v39, %v620_v58  ;;  %v632_v12 = vshll.u32 %v997_v44, %v620_v58 }
  0xfa   :  { %v406_v20 = vsub.s32 32, %v405_v28  ;;  %v410_v32 = vsub.s32 4294967266, %v405_v28  ;;  %v1222_v3 = vshrl.u32 %v550_v0, 30  ;;  %v624_v5 = vshrl.u32 %v995_v37, %v621_v18 }
  0xfb   :  { %v627_v29 = vshrl.u32 %v996_v39, %v621_v18  ;;  %v630_v17 = vshrl.u32 %v997_v44, %v621_v18  ;;  %v407_v30 = vshll.u32 %v398_v15, %v405_v28  ;;  %v633_v38 = vshrl.u32 %v998_v48, %v621_v18 }
  0xfc   :  { %v408_v46 = vshrl.u32 %v390_v59, %v406_v20  ;;  %v411_v25 = vadd.s32 127, %v410_v32  ;;  %v552_v7 = vshll.u32 %v1222_v3, 30  ;;  %v625_v8 = vor.u32 %v624_v5, %v623_v4 }
  0xfd   :  { %v1231_v11 = vor.u32 %v627_v29, %v626_v16  ;;  %v635_v14 = vshll.u32 %v998_v48, %v620_v58  ;;  %v636_v37 = vshrl.u32 %v999_v51, %v621_v18  ;;  %v631_v15 = vor.u32 %v630_v17, %v629_v9 }
  0xfe   :  { %v412_v10 = vshll.u32 %v411_v25, 23  ;;  %v409_v13 = vor.u32 %v408_v46, %v407_v30  ;;  %v553_v33 = vsub.s32 %v549_v23, %v552_v7  ;;  %v634_v36 = vor.u32 %v633_v38, %v632_v12 }
  0xff   :  { %v637_v42 = vor.u32 %v636_v37, %v635_v14  ;;  %vm638_vm9 = vcmp.lt.s32.totalorder %v1220_v19, 1  ;;  %vm641_vm10 = vcmp.lt.s32.totalorder %v1220_v19, 4  ;;  %vm640_vm11 = vcmp.lt.s32.totalorder %v1220_v19, 3 }
 0x100   :  { %v413_v31 = vor.u32 4788187, %v412_v10  ;;  %vm554_vm8 = vcmp.lt.s32.totalorder %v553_v33, 0  ;;  %v555_v40 = vsub.s32 0, %v553_v33  ;;  %v646_v44 = vsel %vm638_vm9, %v625_v8, %v1231_v11 }
 0x101   :  { %v416_v48 = vcvt.s32.f32 %v409_v13  ;;  %v647_v51 = vsel %vm641_vm10, %v634_v36, 920167782  ;;  %vm639_vm12 = vcmp.lt.s32.totalorder %v1220_v19, 2  ;;  %v650_v45 = vsel %vm638_vm9, %v1231_v11, %v631_v15 }
 0x102   :  { %v414_v39 = vand.u32 2147483647, %v413_v31  ;;  %v556_v35 = vsel %vm554_vm8, %v555_v40, %v553_v33  ;;  %v648_v24 = vsel %vm640_vm11, %v631_v15, %v647_v51  ;;  %v651_v50 = vsel %vm641_vm10, %v637_v42, 1326507024 }
 0x103   :  { %v557_v43 = vclz %v556_v35  ;;  %v649_v49 = vsel %vm639_vm12, %v646_v44, %v648_v24  ;;  %v652_v53 = vsel %vm640_vm11, %v634_v36, %v651_v50  ;;  %v655_v55 = vand.u32 65535, %v1242_v21 }
 0x104   :  { %v417_v47 = vmul.f32 %v416_v48, %v414_v39  ;;  %v653_v54 = vsel %vm639_vm12, %v650_v45, %v652_v53  ;;  %v680_v56 = vshrl.u32 %v649_v49, 16  ;;  %v679_v58 = vand.u32 65535, %v649_v49 }
 0x105   :  { %v832_v52 = vadd.s32 4294967294, %v557_v43  ;;  %v657_v22 = vand.u32 65535, %v653_v54  ;;  %v658_v23 = vshrl.u32 %v653_v54, 16  ;;  %v622_v0 = vshrl.u32 %v994_v34, %v621_v18 }
 0x106   :  { %v418_v59 = vxor.u32 2147483648, %v417_v47  ;;  %v656_v20 = vshrl.u32 %v1242_v21, 16  ;;  %v682_v29 = vmul.u32 %v680_v56, %v655_v55  ;;  %v643_v34 = vsel %vm641_vm10, %v631_v15, 2102212464 }
 0x107   :  { %vm833_vm14 = vcmp.lt.s32.totalorder %v832_v52, 0  ;;  %v642_v46 = vsel %vm638_vm9, %v622_v0, %v625_v8  ;;  %v660_v18 = vmul.u32 %v658_v23, %v655_v55  ;;  %v659_v9 = vmul.u32 %v657_v22, %v655_v55 }
 0x108   :  { %v560_v28 = vsel %vm833_vm14, 0, %v832_v52  ;;  %v661_v25 = vmul.u32 %v657_v22, %v656_v20  ;;  %v683_v30 = vmul.u32 %v679_v58, %v656_v20  ;;  %v419_v7 = vsel %vm298_vm13, %v418_v59, %v417_v47 }
 0x109   :  { %v561_v4 = vsub.s32 32, %v560_v28  ;;  %v565_v5 = vsub.s32 4294967266, %v560_v28  ;;  %v562_v16 = vshll.u32 %v553_v33, %v560_v28  ;;  %v663_v27 = vshll.u32 %v660_v18, 16 }
 0x10a   :  { %v681_v41 = vmul.u32 %v679_v58, %v655_v55  ;;  %v662_v38 = vmul.u32 %v658_v23, %v656_v20  ;;  %v685_v13 = vshll.u32 %v682_v29, 16  ;;  %v665_v8 = vshll.u32 %v661_v25, 16 }
 0x10b   :  { %v563_v17 = vshrl.u32 %v545_v1, %v561_v4  ;;  %v566_v2 = vadd.s32 127, %v565_v5  ;;  %vm667_vm0 = vc.u32 %v659_v9, %v663_v27  ;;  %v669_v14 = vadd.s32 %v663_v27, %v659_v9 }
 0x10c   :  { %v684_v37 = vmul.u32 %v680_v56, %v656_v20  ;;  %v668_v33 = vsel %vm667_vm0, 1, %v1000_v57  ;;  %v687_v15 = vshll.u32 %v683_v30, 16  ;;  %vm689_vm1 = vc.u32 %v681_v41, %v685_v13 }
 0x10d   :  { %v564_v10 = vor.u32 %v563_v17, %v562_v16  ;;  %v567_v12 = vshll.u32 %v566_v2, 23  ;;  %v670_v36 = vadd.s32 %v668_v33, %v662_v38  ;;  %vm671_vm2 = vc.u32 %v669_v14, %v665_v8 }
 0x10e   :  { %v690_v40 = vsel %vm689_vm1, 1, %v1000_v57  ;;  %v691_v42 = vadd.s32 %v685_v13, %v681_v41  ;;  %v672_v48 = vsel %vm671_vm2, 1, %v1000_v57  ;;  %v1285_v51 = vsel %vm1267_vm15, %v1054_v62, %v419_v7 }
 0x10f   :  { %v568_v31 = vor.u32 4788187, %v567_v12  ;;  %v571_v44 = vcvt.s32.f32 %v564_v10  ;;  %v692_v35 = vadd.s32 %v690_v40, %v684_v37  ;;  %v664_v43 = vshrl.u32 %v660_v18, 16 }
 0x110   :  { %v674_v24 = vadd.s32 %v672_v48, %v670_v36  ;;  %vm693_vm3 = vc.u32 %v691_v42, %v687_v15  ;;  %v644_v47 = vsel %vm640_vm11, %v1231_v11, %v643_v34  ;;  %v420_v50 = vsub.s32 4, %v1189_v6 }
 0x111   :  { %v569_v39 = vand.u32 2147483647, %v568_v31  ;;  %v694_v49 = vsel %vm693_vm3, 1, %v1000_v57  ;;  %v666_v52 = vshrl.u32 %v661_v25, 16  ;;  %v686_v54 = vshrl.u32 %v682_v29, 16 }
 0x112   :  { %v675_v53 = vadd.s32 %v674_v24, %v664_v43  ;;  %v696_v55 = vadd.s32 %v694_v49, %v692_v35  ;;  %v424_v56 = vmul.f32 %v1285_v51, %v1285_v51  ;;  %v688_v57 = vshrl.u32 %v683_v30, 16 }
 0x113   :  { %v572_v45 = vmul.f32 %v571_v44, %v569_v39  ;;  %v645_v28 = vsel %vm639_vm12, %v642_v46, %v644_v47  ;;  %v1307_v0 = vadd.s32 %v691_v42, %v687_v15  ;;  %v575_v20 = vsub.s32 4, %v1222_v3 }
 0x114   :  { %v1301_v11 = vadd.s32 %v675_v53, %v666_v52  ;;  %v697_v58 = vadd.s32 %v696_v55, %v686_v54  ;;  %v421_v4 = vsel %vm298_vm13, %v420_v50, %v1189_v6  ;;  %v425_v29 = vmul.f32 -0.001358992, %v424_v56 }
 0x115   :  { %v573_v22 = vxor.u32 2147483648, %v572_v45  ;;  %v432_v19 = vmul.f32 -0.00019511016, %v424_v56  ;;  %v699_v46 = vmul.u32 %v1242_v21, %v645_v28  ;;  %v576_v16 = vsel %vm453_vm4, %v575_v20, %v1222_v3 }
 0x116   :  { %v698_v1 = vadd.s32 %v697_v58, %v688_v57  ;;  %vm701_vm6 = vc.u32 %v1301_v11, %v1307_v0  ;;  %v426_v18 = vadd.f32 0.041655596, %v425_v29  ;;  %v423_v6 = vsel %vm1267_vm15, 0, %v421_v4 }
 0x117   :  { %v574_v59 = vsel %vm453_vm4, %v573_v22, %v572_v45  ;;  %v433_v25 = vadd.f32 0.008332121, %v432_v19  ;;  %v578_v21 = vsel %vm1297_vm5, 0, %v576_v16  ;;  %v440_v14 = vadd.s32 3, %v423_v6 }
 0x118   :  { %v577_v63 = vsel %vm1297_vm5, %v1052_v61, %v574_v59  ;;  %v702_v34 = vadd.s32 1, %v698_v1  ;;  %v427_v9 = vmul.f32 %v426_v18, %v424_v56  ;;  %v595_v36 = vadd.s32 3, %v578_v21 }
 0x119   :  { %v579_v5 = vmul.f32 %v577_v63, %v577_v63  ;;  %v434_v27 = vmul.f32 %v433_v25, %v424_v56  ;;  %v441_v48 = vand.u32 3, %v440_v14  ;;  %vm439_vm11 = vweird.f32 %v1054_v62 }
 0x11a   :  { %v703_v2 = vsel %vm701_vm6, %v702_v34, %v698_v1  ;;  %v428_v38 = vadd.f32 -0.4999988, %v427_v9  ;;  %v596_v53 = vand.u32 3, %v595_v36  ;;  %vm594_vm15 = vweird.f32 %v1052_v61 }
 0x11b   :  { %v580_v17 = vmul.f32 -0.001358992, %v579_v5  ;;  %v587_v30 = vmul.f32 -0.00019511016, %v579_v5  ;;  %v704_v7 = vadd.s32 %v703_v2, %v699_v46  ;;  %v435_v13 = vadd.f32 -0.16666654, %v434_v27 }
 0x11c   :  { %v429_v31 = vmul.f32 %v428_v38, %v424_v56  ;;  %vm443_vm8 = vcmp.eq.s32.totalorder %v441_v48, 0  ;;  %vm446_vm9 = vcmp.eq.s32.totalorder %v441_v48, 2  ;;  %vm442_vm10 = vcmp.lt.s32.totalorder %v441_v48, 2 }
 0x11d   :  { %v581_v41 = vadd.f32 0.041655596, %v580_v17  ;;  %v588_v10 = vadd.f32 0.008332121, %v587_v30  ;;  %v705_v12 = vadd.s32 536870912, %v704_v7  ;;  %v436_v32 = vmul.f32 %v435_v13, %v424_v56 }
 0x11e   :  { %v430_v42 = vadd.f32 1.0, %v429_v31  ;;  %vm598_vm12 = vcmp.eq.s32.totalorder %v596_v53, 0  ;;  %vm601_vm13 = vcmp.eq.s32.totalorder %v596_v53, 2  ;;  %vm597_vm14 = vcmp.lt.s32.totalorder %v596_v53, 2 }
 0x11f   :  { %v582_v8 = vmul.f32 %v581_v41, %v579_v5  ;;  %v589_v3 = vmul.f32 %v588_v10, %v579_v5  ;;  %v1326_v37 = vshrl.u32 %v705_v12, 30  ;;  %v437_v39 = vadd.f32 1.0, %v436_v32 }
 0x120   :  { %v447_v45 = vxor.u32 2147483648, %v430_v42  ;;  %v700_v62 = vadd.s32 %v1307_v0, %v1301_v11  ;;  %vm608_vm1 = vcmp.lt.s32.totalorder %v1185_v60, 0  ;;  %vm607_vm2 = vcmp.le.f32.partialorder %v606_v26, 0.7853982 }
 0x121   :  { %v583_v33 = vadd.f32 -0.4999988, %v582_v8  ;;  %v590_v15 = vadd.f32 -0.16666654, %v589_v3  ;;  %v707_v40 = vshll.u32 %v1326_v37, 30  ;;  %v438_v24 = vmul.f32 %v437_v39, %v1285_v51 }
 0x122   :  { %v730_v0 = vsub.s32 4, %v1326_v37  ;;  %vm749_vm6 = vweird.f32 %v1185_v60 }
 0x123   :  { %v584_v44 = vmul.f32 %v583_v33, %v579_v5  ;;  %v591_v35 = vmul.f32 %v590_v15, %v579_v5  ;;  %v708_v43 = vsub.s32 %v704_v7, %v707_v40  ;;  %v444_v52 = vxor.u32 2147483648, %v438_v24 }
 0x124   :  { %v448_v23 = vsel %vm446_vm9, %v447_v45, %v438_v24  ;;  %v731_v21 = vsel %vm608_vm1, %v730_v0, %v1326_v37 }
 0x125   :  { %v585_v47 = vadd.f32 1.0, %v584_v44  ;;  %v592_v49 = vadd.f32 1.0, %v591_v35  ;;  %vm709_vm7 = vcmp.lt.s32.totalorder %v708_v43, 0  ;;  %v710_v50 = vsub.s32 0, %v708_v43 }
 0x126   :  { %v445_v22 = vsel %vm443_vm8, %v430_v42, %v444_v52  ;;  %v733_v38 = vsel %vm607_vm2, 0, %v731_v21 }
 0x127   :  { %v593_v54 = vmul.f32 %v592_v49, %v577_v63  ;;  %v602_v55 = vxor.u32 2147483648, %v585_v47  ;;  %v711_v56 = vsel %vm709_vm7, %v710_v50, %v708_v43  ;;  %v449_v58 = vsel %vm442_vm10, %v445_v22, %v448_v23 }
 0x128   :  { %v712_v57 = vclz %v711_v56  ;;  %v450_v59 = vsel %vm439_vm11, nan, %v449_v58  ;;  %v750_v31 = vadd.s32 3, %v733_v38 }
 0x129   :  { %v599_v51 = vxor.u32 2147483648, %v593_v54  ;;  %v603_v1 = vsel %vm601_vm13, %v602_v55, %v593_v54  ;;  %761 = vst [vmem:[#allocation10] sm:$0xff] %v450_v59 }
 0x12a   :  { %v835_v28 = vadd.s32 4294967294, %v712_v57  ;;  %v751_v36 = vand.u32 3, %v750_v31 }
 0x12b   :  { %v600_v20 = vsel %vm598_vm12, %v585_v47, %v599_v51 }
 0x12c   :  { %v604_v63 = vsel %vm597_vm14, %v600_v20, %v603_v1  ;;  %vm836_vm0 = vcmp.lt.s32.totalorder %v835_v28, 0  ;;  %vm753_vm3 = vcmp.eq.s32.totalorder %v751_v36, 0  ;;  %vm756_vm4 = vcmp.eq.s32.totalorder %v751_v36, 2 }
 0x12d   :  { %v605_v4 = vsel %vm594_vm15, nan, %v604_v63  ;;  %v715_v5 = vsel %vm836_vm0, 0, %v835_v28  ;;  %vm752_vm5 = vcmp.lt.s32.totalorder %v751_v36, 2 }
 0x12e   :  { %762 = vst [vmem:[#allocation10 + $0x8] sm:$0xff] %v605_v4  ;;  %v716_v29 = vsub.s32 32, %v715_v5  ;;  %v720_v19 = vsub.s32 4294967266, %v715_v5  ;;  %v717_v46 = vshll.u32 %v708_v43, %v715_v5 }
 0x130   :  { %v718_v34 = vshrl.u32 %v700_v62, %v716_v29  ;;  %v721_v18 = vadd.s32 127, %v720_v19 }
 0x132   :  { %v719_v25 = vor.u32 %v718_v34, %v717_v46  ;;  %v722_v16 = vshll.u32 %v721_v18, 23 }
 0x134   :  { %v723_v17 = vor.u32 4788187, %v722_v16  ;;  %v726_v6 = vcvt.s32.f32 %v719_v25 }
 0x136   :  { %v724_v2 = vand.u32 2147483647, %v723_v17 }
 0x138   :  { %v727_v30 = vmul.f32 %v726_v6, %v724_v2 }
 0x13a   :  { %v728_v61 = vxor.u32 2147483648, %v727_v30 }
 0x13c   :  { %v729_v7 = vsel %vm608_vm1, %v728_v61, %v727_v30 }
 0x13d   :  { %v732_v11 = vsel %vm607_vm2, %v1185_v60, %v729_v7 }
 0x13e   :  { %v734_v9 = vmul.f32 %v732_v11, %v732_v11 }
 0x140   :  { %v735_v27 = vmul.f32 -0.001358992, %v734_v9  ;;  %v742_v41 = vmul.f32 -0.00019511016, %v734_v9 }
 0x142   :  { %v736_v10 = vadd.f32 0.041655596, %v735_v27  ;;  %v743_v12 = vadd.f32 0.008332121, %v742_v41 }
 0x144   :  { %v737_v13 = vmul.f32 %v736_v10, %v734_v9  ;;  %v744_v8 = vmul.f32 %v743_v12, %v734_v9 }
 0x146   :  { %v738_v14 = vadd.f32 -0.4999988, %v737_v13  ;;  %v745_v3 = vadd.f32 -0.16666654, %v744_v8 }
 0x148   :  { %v739_v32 = vmul.f32 %v738_v14, %v734_v9  ;;  %v746_v26 = vmul.f32 %v745_v3, %v734_v9 }
 0x14a   :  { %v740_v33 = vadd.f32 1.0, %v739_v32  ;;  %v747_v15 = vadd.f32 1.0, %v746_v26 }
 0x14c   :  { %v748_v40 = vmul.f32 %v747_v15, %v732_v11  ;;  %v757_v42 = vxor.u32 2147483648, %v740_v33 }
 0x14e   :  { %v754_v39 = vxor.u32 2147483648, %v748_v40  ;;  %v758_v44 = vsel %vm756_vm4, %v757_v42, %v748_v40 }
 0x150   :  { %v755_v37 = vsel %vm753_vm3, %v740_v33, %v754_v39 }
 0x151   :  { %v759_v48 = vsel %vm752_vm5, %v755_v37, %v758_v44 }
 0x152   :  { %v760_v35 = vsel %vm749_vm6, nan, %v759_v48 }
 0x153   :  { %763 = vst [vmem:[#allocation10 + $0x10] sm:$0xff] %v760_v35 }
 0x154   :  { %774 = dma.vmem_to_hbm [thread:$0]  %s770_s3, 384, %s772_s11, [#allocation4]  }
 0x155   :  { %986 = dma.done.wait [#allocation4], 384  }
 0x156   :  { %987 = vsyncadd [#allocation4], 4294966912 }
 0x157   :  { %779 = vsyncpa [#allocation3], 1 }
 0x158   :  { %780 = vsyncpa [#allocation6], 1 }
 0x159   :  { %781 = vsyncpa [#allocation9], 1 }
 0x15a   :  { %782 = vsyncpa [#allocation4], 1 }

</bundles_post_ra>
